<compile_context>
chip_gen: v5e
topology: v5e:2x2
jax: 0.10.0
libtpu: 0.0.40
codegen_flags: <defaults>
</compile_context>

<pallas_src>
import functools

import jax
import jax.numpy as jnp
from jax.experimental import pallas as pl
from jax.experimental.pallas import tpu as pltpu


def _vmem_limit_bytes():
    """Per-kernel scoped-VMEM limit derived from the chip's physical VMEM."""
    cap = 64 * 1024 * 1024  # conservative default (v7x physical VMEM per core)
    try:
        info = pltpu.get_tpu_info()
        cap = int(getattr(info, "vmem_capacity_bytes", cap))
    except Exception:
        pass
    # -> 64 MiB on v5e/v6e (128 MiB physical), 48 MiB on v7x (64 MiB physical).
    return int(min(cap * 3 // 4, 64 * 1024 * 1024))


def _block_elem_budget(vmem_limit):
    """Target f32 elements per block: pipeline ~= 2x in + 2x out buffers + temps."""
    return int(min(2 * 1024 * 1024, max(256 * 1024, vmem_limit // 32)))


def _largest_divisor(total, unit, cap):
    """Largest multiple-of-`unit` divisor of `total` that is <= cap (or None)."""
    best = None
    cap = min(cap, total)
    d = unit
    while d <= cap:
        if total % d == 0:
            best = d
        d += unit
    return best


def _pick_tiles(rows, lanes, budget, *, split_rows):
    """(row_tile, lane_tile) for a 2-D (rows, lanes) view; tiles divide evenly."""
    if lanes % 128 == 0:
        min_rows = 8 if rows >= 8 else max(rows, 1)
        lane_cap = max(128, (budget // min_rows) // 128 * 128)
        lt = _largest_divisor(lanes, 128, lane_cap) or lanes
    else:
        lt = lanes  # full-extent lane block (always legal), guarded by row tiling
    row_cap = max(1, budget // lt)
    if split_rows and rows >= 16:
        row_cap = min(row_cap, rows // 2)  # keep >= 2 parallel row blocks (v7x)
    rt = _largest_divisor(rows, 8, row_cap)
    if rt is None:
        rt = 8 if rows % 8 == 0 else rows  # fall back to full-extent rows
    if rt * lt > budget and lanes % 128 == 0:
        lt = _largest_divisor(lanes, 128,
                              max(128, (budget // rt) // 128 * 128)) or lt
    return rt, lt


def _stats_rows_kernel(x_ref, out_ref, acc_ref):
    """Per-row sum / sum-of-squares of a (Rt, Lt) block, reduced over grid axis 1.

    x_ref:   (Rt, Lt)   input tile
    out_ref: (1, Rt, 2) per-row partials for this parallel slot (written once)
    acc_ref: (Rt, 2)    f32 VMEM accumulator, live across the reduction axis
    """
    l = pl.program_id(1)

    @pl.when(l == 0)
    def _():
        acc_ref[...] = jnp.zeros_like(acc_ref)

    x = x_ref[...].astype(jnp.float32)
    acc_ref[:, 0:1] += jnp.sum(x, axis=1, keepdims=True)      # lane reduce
    acc_ref[:, 1:2] += jnp.sum(x * x, axis=1, keepdims=True)

    @pl.when(l == pl.num_programs(1) - 1)
    def _():
        out_ref[0, :, :] = acc_ref[...]


def _stats_lanes_kernel(x_ref, out_ref):
    """Per-lane sum / sum-of-squares of a (Rt, Vt) block (rows carry batch only).

    x_ref:   (Rt, Vt)
    out_ref: (1, 2, Vt) partials for this (row-block, lane-block) grid cell
    """
    x = x_ref[...].astype(jnp.float32)
    # Sublane-first reduction: mostly VALU vreg adds, tiny XLU tail.
    out_ref[0, 0:1, :] = jnp.sum(x, axis=0, keepdims=True)
    out_ref[0, 1:2, :] = jnp.sum(x * x, axis=0, keepdims=True)


def _norm_affine_relu_kernel(x_ref, scale_ref, shift_ref, o_ref):
    """out = max(x * scale + shift, 0); scale/shift broadcast along rows or lanes."""
    s = scale_ref[...]
    b = shift_ref[...]
    y = x_ref[...].astype(s.dtype) * s + b
    o_ref[...] = jnp.maximum(y, 0.0).astype(o_ref.dtype)


@functools.partial(jax.jit, static_argnames=("eps",))
def batchnorm1d_relu(x, gamma, beta, *, eps=1e-5):
    """Training-mode BatchNorm1d + ReLU.  x: (N, C, L) or (N, C); gamma/beta: (C,)."""
    orig_shape = x.shape
    if x.ndim == 2:
        N, C = x.shape
        L = 1
    elif x.ndim == 3:
        N, C, L = x.shape
    else:
        raise ValueError("BatchNorm1d expects (N, C) or (N, C, L) input")

    vmem_limit = _vmem_limit_bytes()
    budget = _block_elem_budget(vmem_limit)
    f32 = jnp.float32
    # TODO(synk): on v5e the VPU has no bf16 ALUs; a chip check could keep the
    # f32 upcast there.  bf16 math (when input is bf16) is used everywhere here.
    compute_dtype = x.dtype if x.dtype == jnp.bfloat16 else f32

    lane_channels = L < 128  # small-L path: lanes carry C*L, rows carry N

    stats_params = pltpu.CompilerParams(
        dimension_semantics=("parallel", "arbitrary"),
        vmem_limit_bytes=vmem_limit)
    par_params = pltpu.CompilerParams(
        dimension_semantics=("parallel", "parallel"),
        vmem_limit_bytes=vmem_limit)

    if lane_channels:
        rows, lanes = N, C * L
        xv = x.reshape(rows, lanes)                    # free row-major reshape
        rt, lt = _pick_tiles(rows, lanes, budget, split_rows=True)
        n_r, n_l = rows // rt, lanes // lt

        # ---- Pass 1: per-lane partial sums, one slot per (row-block, lane-block).
        partials = pl.pallas_call(
            _stats_lanes_kernel,
            out_shape=jax.ShapeDtypeStruct((n_r, 2, lanes), f32),
            grid=(n_r, n_l),
            in_specs=[pl.BlockSpec((rt, lt), lambda r, c: (r, c))],
            out_specs=pl.BlockSpec((1, 2, lt), lambda r, c: (r, 0, c)),
            compiler_params=par_params,
        )(xv)
        ch = partials.sum(axis=0).reshape(2, C, L).sum(axis=2)     # (2, C)
        sum_c, sumsq_c = ch[0], ch[1]
    else:
        rows, lanes = N * C, L
        xv = x.reshape(rows, lanes)
        rt, lt = _pick_tiles(rows, lanes, budget, split_rows=True)
        n_r, n_l = rows // rt, lanes // lt

        # v7x megacore: with a single row block, split the reduction axis into
        # two parallel super-chunks so both TensorCores stream pass 1.
        if n_r == 1 and n_l >= 2 and n_l % 2 == 0:
            n_par, n_red = 2, n_l // 2
            x_idx = lambda p, l, _k=n_red: (0, p * _k + l)
        else:
            n_par, n_red = n_r, n_l
            x_idx = lambda p, l: (p, l)

        # ---- Pass 1: per-row partial sums, reduced over the lane-block axis.
        partials = pl.pallas_call(
            _stats_rows_kernel,
            out_shape=jax.ShapeDtypeStruct((n_par, rt, 2), f32),
            grid=(n_par, n_red),
            in_specs=[pl.BlockSpec((rt, lt), x_idx)],
            out_specs=pl.BlockSpec((1, rt, 2), lambda p, l: (p, 0, 0)),
            scratch_shapes=[pltpu.VMEM((rt, 2), f32)],
            compiler_params=stats_params,
        )(xv)
        ch = partials.reshape(-1, C, 2).sum(axis=0)                # (C, 2)
        sum_c, sumsq_c = ch[:, 0], ch[:, 1]

    # ---- O(C) glue: fold mean / var / affine into per-channel scale & shift.
    count = jnp.asarray(N * L, f32)
    mean = sum_c / count
    ex2 = sumsq_c / count
    # NOTE: E[x^2] - mean^2 in f32, clamped against cancellation.  For inputs
    # with |mean| >> std a centered two-pass variance would be more accurate.
    var = jnp.maximum(ex2 - mean * mean, 0.0)
    inv_std = jax.lax.rsqrt(var + jnp.asarray(eps, f32))
    scale = gamma.astype(f32) * inv_std                            # (C,)
    shift = beta.astype(f32) - mean * scale                        # (C,)

    # ---- Pass 2: y = max(x * scale + shift, 0), lane-dense streaming write.
    if lane_channels:
        scale_b = jnp.repeat(scale, L).reshape(1, lanes).astype(compute_dtype)
        shift_b = jnp.repeat(shift, L).reshape(1, lanes).astype(compute_dtype)
        param_spec = pl.BlockSpec((1, lt), lambda r, c: (0, c))
    else:
        scale_b = jnp.tile(scale, N).reshape(rows, 1).astype(compute_dtype)
        shift_b = jnp.tile(shift, N).reshape(rows, 1).astype(compute_dtype)
        param_spec = pl.BlockSpec((rt, 1), lambda r, c: (r, 0))

    out = pl.pallas_call(
        _norm_affine_relu_kernel,
        out_shape=jax.ShapeDtypeStruct((rows, lanes), x.dtype),
        grid=(n_r, n_l),
        in_specs=[pl.BlockSpec((rt, lt), lambda r, c: (r, c)),
                  param_spec, param_spec],
        out_specs=pl.BlockSpec((rt, lt), lambda r, c: (r, c)),
        compiler_params=par_params,
    )(xv, scale_b, shift_b)
    return out.reshape(orig_shape)


def _reference(x, gamma, beta, eps=1e-5):
    axes = (0,) if x.ndim == 2 else (0, 2)
    shape = (1, -1) if x.ndim == 2 else (1, -1, 1)
    mean = jnp.mean(x, axis=axes, keepdims=True)
    var = jnp.mean((x - mean) ** 2, axis=axes, keepdims=True)
    y = (x - mean) / jnp.sqrt(var + eps)
    y = y * gamma.reshape(shape) + beta.reshape(shape)
    return jnp.maximum(y, 0.0)


if __name__ == "__main__":
    key = jax.random.PRNGKey(0)
    kx, kg, kb, kx2 = jax.random.split(key, 4)

    # Primary check: small (N, C, L) input (small-L / lane-channel path).
    N, C, L = 2, 4, 16
    x = jax.random.normal(kx, (N, C, L), dtype=jnp.float32)
    gamma = 1.0 + 0.1 * jax.random.normal(kg, (C,), dtype=jnp.float32)
    beta = 0.1 * jax.random.normal(kb, (C,), dtype=jnp.float32)

    out = jax.block_until_ready(batchnorm1d_relu(x, gamma, beta, eps=1e-5))
    ref = _reference(x, gamma, beta, eps=1e-5)
    assert out.shape == (N, C, L)
    assert jnp.allclose(out, ref, atol=1e-5, rtol=1e-5), "mismatch (small-L path)"

    # Secondary check: L >= 128 exercises the row-major (N*C, L) path.
    N2, C2, L2 = 2, 4, 256
    x2 = jax.random.normal(kx2, (N2, C2, L2), dtype=jnp.float32)
    out2 = jax.block_until_ready(batchnorm1d_relu(x2, gamma, beta, eps=1e-5))
    ref2 = _reference(x2, gamma, beta, eps=1e-5)
    assert out2.shape == (N2, C2, L2)
    assert jnp.allclose(out2, ref2, atol=1e-4, rtol=1e-4), "mismatch (large-L path)"

    print("KERNEL_OK")
</pallas_src>

<mosaic_0001>
module attributes {stable_mosaic.version = 11 : i64} {
  func.func @_stats_lanes_kernel(%arg0: i32, %arg1: i32, %arg2: memref<2x64xf32, #tpu.memory_space<vmem>>, %arg3: memref<1x2x64xf32, #tpu.memory_space<vmem>>) attributes {dimension_semantics = [#tpu.dimension_semantics<parallel>, #tpu.dimension_semantics<parallel>], iteration_bounds = array<i64: 1, 1>, scalar_prefetch = 0 : i64, scratch_operands = 0 : i64, tpu.core_type = #tpu.core_type<tc>, window_params = [{transform_indices = @transform_0, window_bounds = array<i64: 2, 64>}, {transform_indices = @transform_1, window_bounds = array<i64: 1, 2, 64>}]} {
    %c0 = arith.constant 0 : index
    %c0_0 = arith.constant 0 : index
    %0 = vector.load %arg2[%c0, %c0_0] : memref<2x64xf32, #tpu.memory_space<vmem>>, vector<2x64xf32>
    %cst = arith.constant dense<0.000000e+00> : vector<64xf32>
    %1 = vector.multi_reduction <add>, %0, %cst [0] : vector<2x64xf32> to vector<64xf32>
    %2 = vector.shape_cast %1 : vector<64xf32> to vector<1x64xf32>
    %c0_1 = arith.constant 0 : index
    %c0_2 = arith.constant 0 : index
    %c0_3 = arith.constant 0 : index
    %3 = vector.load %arg3[%c0_1, %c0_2, %c0_3] : memref<1x2x64xf32, #tpu.memory_space<vmem>>, vector<1x1x64xf32>
    %4 = vector.shape_cast %3 : vector<1x1x64xf32> to vector<1x64xf32>
    %5 = vector.shape_cast %2 : vector<1x64xf32> to vector<1x1x64xf32>
    tpu.vector_store %arg3[%c0_1, %c0_2, %c0_3], %5 {strides = array<i32>} : memref<1x2x64xf32, #tpu.memory_space<vmem>>, vector<1x1x64xf32>,
    %6 = arith.mulf %0, %0 : vector<2x64xf32>
    %cst_4 = arith.constant dense<0.000000e+00> : vector<64xf32>
    %7 = vector.multi_reduction <add>, %6, %cst_4 [0] : vector<2x64xf32> to vector<64xf32>
    %8 = vector.shape_cast %7 : vector<64xf32> to vector<1x64xf32>
    %c0_5 = arith.constant 0 : index
    %c1 = arith.constant 1 : index
    %c0_6 = arith.constant 0 : index
    %9 = vector.load %arg3[%c0_5, %c1, %c0_6] : memref<1x2x64xf32, #tpu.memory_space<vmem>>, vector<1x1x64xf32>
    %10 = vector.shape_cast %9 : vector<1x1x64xf32> to vector<1x64xf32>
    %11 = vector.shape_cast %8 : vector<1x64xf32> to vector<1x1x64xf32>
    tpu.vector_store %arg3[%c0_5, %c1, %c0_6], %11 {strides = array<i32>} : memref<1x2x64xf32, #tpu.memory_space<vmem>>, vector<1x1x64xf32>,
    return
  }
  func.func @transform_0(%arg0: i32, %arg1: i32) -> (i32, i32) {
    %c0_i32 = arith.constant 0 : i32
    return %arg0, %arg1 : i32, i32
  }
  func.func @transform_1(%arg0: i32, %arg1: i32) -> (i32, i32, i32) {
    %c0_i32 = arith.constant 0 : i32
    %c0_i32_0 = arith.constant 0 : i32
    return %arg0, %c0_i32, %arg1 : i32, i32, i32
  }
}

module attributes {stable_mosaic.version = 11 : i64} {
  func.func @_norm_affine_relu_kernel(%arg0: i32, %arg1: i32, %arg2: memref<2x64xf32, #tpu.memory_space<vmem>>, %arg3: memref<1x64xf32, #tpu.memory_space<vmem>>, %arg4: memref<1x64xf32, #tpu.memory_space<vmem>>, %arg5: memref<2x64xf32, #tpu.memory_space<vmem>>) attributes {dimension_semantics = [#tpu.dimension_semantics<parallel>, #tpu.dimension_semantics<parallel>], iteration_bounds = array<i64: 1, 1>, scalar_prefetch = 0 : i64, scratch_operands = 0 : i64, tpu.core_type = #tpu.core_type<tc>, window_params = [{transform_indices = @transform_0, window_bounds = array<i64: 2, 64>}, {transform_indices = @transform_1, window_bounds = array<i64: 1, 64>}, {transform_indices = @transform_2, window_bounds = array<i64: 1, 64>}, {transform_indices = @transform_3, window_bounds = array<i64: 2, 64>}]} {
    %c0 = arith.constant 0 : index
    %c0_0 = arith.constant 0 : index
    %0 = vector.load %arg3[%c0, %c0_0] : memref<1x64xf32, #tpu.memory_space<vmem>>, vector<1x64xf32>
    %c0_1 = arith.constant 0 : index
    %c0_2 = arith.constant 0 : index
    %1 = vector.load %arg4[%c0_1, %c0_2] : memref<1x64xf32, #tpu.memory_space<vmem>>, vector<1x64xf32>
    %c0_3 = arith.constant 0 : index
    %c0_4 = arith.constant 0 : index
    %2 = vector.load %arg2[%c0_3, %c0_4] : memref<2x64xf32, #tpu.memory_space<vmem>>, vector<2x64xf32>
    %3 = vector.broadcast %0 : vector<1x64xf32> to vector<2x64xf32>
    %4 = arith.mulf %2, %3 : vector<2x64xf32>
    %5 = vector.broadcast %1 : vector<1x64xf32> to vector<2x64xf32>
    %6 = arith.addf %4, %5 : vector<2x64xf32>
    %cst = arith.constant 0.000000e+00 : f32
    %7 = vector.broadcast %cst : f32 to vector<2x64xf32>
    %8 = arith.maximumf %6, %7 : vector<2x64xf32>
    %c0_5 = arith.constant 0 : index
    %c0_6 = arith.constant 0 : index
    %9 = vector.load %arg5[%c0_5, %c0_6] : memref<2x64xf32, #tpu.memory_space<vmem>>, vector<2x64xf32>
    tpu.vector_store %arg5[%c0_5, %c0_6], %8 {strides = array<i32>} : memref<2x64xf32, #tpu.memory_space<vmem>>, vector<2x64xf32>,
    return
  }
  func.func @transform_0(%arg0: i32, %arg1: i32) -> (i32, i32) {
    %c0_i32 = arith.constant 0 : i32
    return %arg0, %arg1 : i32, i32
  }
  func.func @transform_1(%arg0: i32, %arg1: i32) -> (i32, i32) {
    %c0_i32 = arith.constant 0 : i32
    %c0_i32_0 = arith.constant 0 : i32
    return %c0_i32, %arg1 : i32, i32
  }
  func.func @transform_2(%arg0: i32, %arg1: i32) -> (i32, i32) {
    %c0_i32 = arith.constant 0 : i32
    %c0_i32_0 = arith.constant 0 : i32
    return %c0_i32, %arg1 : i32, i32
  }
  func.func @transform_3(%arg0: i32, %arg1: i32) -> (i32, i32) {
    %c0_i32 = arith.constant 0 : i32
    return %arg0, %arg1 : i32, i32
  }
}

</mosaic_0001>

<bundles_post_ra>
// kernel: batchnorm1d_relu.3
= control target key start
LH: loop header
LB: loop body
LE: loop exit
PB: predicated region body
PF: predicated region fallthrough
CT: control target
= control target key end

     0   :  { %vm26_vm0 = vcmask 517120   ;;  %s66_s0 = inlined_call_operand.vmem [shape: f32[2,64], index: 0, kind: input, shape index: {}]   ;;  %s67_s1 = inlined_call_operand.vmem [shape: f32[1,64], index: 1, kind: input, shape index: {}]   ;;  %s68_s2 = inlined_call_operand.vmem [shape: f32[1,64], index: 2, kind: input, shape index: {}]   ;;  %s69_s3 = inlined_call_operand.vmem [shape: f32[2,64], index: 3, kind: output, shape index: {}]  }
   0x1   :  { %v16_v0 = vld [vmem:[%s66_s0] sm:$0x3] }
   0x2   :  { %v32_v1 = vld [vmem:[%s67_s1] ss:$0 sm:$0xff] }
   0x3   :  { %v33_v2 = vld [vmem:[%s68_s2] ss:$0 sm:$0xff]  ;;  %v20_v3 = vmul.f32 %v32_v1, %v16_v0 }
   0x5   :  { %v24_v4 = vadd.f32 %v33_v2, %v20_v3 }
   0x7   :  { %v25_v5 = vmax.f32 %v24_v4, 0.0 }
   0x9   :  { %27 = vst.msk [vmem:[%s69_s3] sm:$0x3] %vm26_vm0, %v25_v5 }

// kernel: batchnorm1d_relu.2
= control target key start
LH: loop header
LB: loop body
LE: loop exit
PB: predicated region body
PF: predicated region fallthrough
CT: control target
= control target key end

     0   :  { %vm9_vm0 = vcmask 517120   ;;  %vm17_vm1 = vcmask 516096   ;;  %s51_s0 = inlined_call_operand.vmem [shape: f32[2,64], index: 0, kind: input, shape index: {}]   ;;  %s52_s1 = inlined_call_operand.vmem [shape: f32[1,2,64], index: 1, kind: output, shape index: {}]  }
   0x1   :  { %v8_v0 = vld [vmem:[%s51_s0] sm:$0x3] }
   0x2   :  { %v10_v1 = vsel %vm9_vm0, %v8_v0, 0.0  ;;  %v19_v2 = vmul.f32 %v8_v0, %v8_v0 }
   0x3   :  { %v11_v3 = vrot.slane %v10_v1, 4 }
   0x4   :  { %v20_v4 = vsel %vm9_vm0, %v19_v2, 0.0 }
   0x5   :  { %v12_v5 = vadd.f32 %v11_v3, %v10_v1  ;;  %v21_v6 = vrot.slane %v20_v4, 4 }
   0x7   :  { %v13_v7 = vrot.slane %v12_v5, 2  ;;  %v22_v8 = vadd.f32 %v21_v6, %v20_v4 }
   0x9   :  { %v14_v9 = vadd.f32 %v13_v7, %v12_v5  ;;  %v23_v10 = vrot.slane %v22_v8, 2 }
   0xb   :  { %v15_v11 = vrot.slane %v14_v9, 1  ;;  %v24_v12 = vadd.f32 %v23_v10, %v22_v8 }
   0xd   :  { %v16_v13 = vadd.f32 %v15_v11, %v14_v9  ;;  %v25_v14 = vrot.slane %v24_v12, 1 }
   0xf   :  { %18 = vst.msk [vmem:[%s52_s1] sm:$0x1] %vm17_vm1, %v16_v13  ;;  %v26_v15 = vadd.f32 %v25_v14, %v24_v12 }
  0x11   :  { %27 = vst.msk [vmem:[%s52_s1 + $0x1] sm:$0x1] %vm17_vm1, %v26_v15 }

</bundles_post_ra>
